<compile_context>
chip_gen: v7x
topology: tpu7x:2x2x1
jax: 0.10.0
libtpu: 0.0.40
codegen_flags: <defaults>
</compile_context>

<pallas_src>
import functools

import jax
import jax.numpy as jnp
from jax import lax
from jax.experimental import pallas as pl
from jax.experimental.pallas import tpu as pltpu

_LANES = 128      # vreg lane width
_SUBLANES = 8     # f32 sublane count


def _round_up(x, m):
    return ((x + m - 1) // m) * m


def _cdiv(a, b):
    return (a + b - 1) // b


def _vmem_capacity_bytes():
    """Generation-aware VMEM capacity (64 MiB/TC on v7x, 128 MiB on v5e/v6e)."""
    try:
        info = pltpu.get_tpu_info()
        for name in ("vmem_capacity_bytes", "vmem_size_bytes", "vmem_bytes"):
            v = getattr(info, name, None)
            if v:
                return int(v)
    except Exception:
        pass
    return 64 * 1024 * 1024   # conservative fallback = v7x per-TensorCore


def _pseudolikelihood_kernel(logits_ref, tok_ref, w_ref, out_ref, *, cg, unroll):
    """Weighted pseudolikelihood partial for one tile of 128-row groups.

    Lane-dense layout (rows on lanes, vocab on sublanes):
      logits_ref : (TG, d_pad, 128) storage dtype (bf16/f32), upcast in-kernel
      tok_ref    : (TG, 1, 128) int32 target ids (exact; no f32 smuggling)
      w_ref      : (TG, 1, 128) f32 per-row weight (0 for padded rows)
      out_ref    : (1, 1, 128) f32 per-lane partial sums for this tile
    """
    tg, d_pad, lanes = logits_ref.shape
    n_chunks = tg // cg

    # Vocab-index iota hoisted out of the chunk loop (JAX does not CSE
    # broadcast_in_dim; rebuilding it per chunk is pure VALU filler).
    vocab_iota = lax.broadcasted_iota(jnp.int32, (cg, d_pad, lanes), 1)

    def body(c, acc):
        g0 = pl.multiple_of(c * cg, cg)
        x = logits_ref[pl.ds(g0, cg), :, :].astype(jnp.float32)   # (CG, d_pad, 128)
        tok = tok_ref[pl.ds(g0, cg), :, :]                        # (CG, 1, 128)
        w = w_ref[pl.ds(g0, cg), :, :]                            # (CG, 1, 128)

        # Numerically stable logsumexp over the vocab (sublane) axis.
        m = jnp.max(x, axis=1, keepdims=True)                     # (CG, 1, 128)
        lse = jnp.log(jnp.sum(jnp.exp(x - m), axis=1, keepdims=True)) + m

        # logits[target] via sublane-iota == token mask (no one-hot in HBM).
        tgt = jnp.sum(jnp.where(vocab_iota == tok, x, 0.0),
                      axis=1, keepdims=True)                      # (CG, 1, 128)

        # Per-row weighted CE, accumulated into a per-lane vector; the single
        # cross-lane reduction is done outside the kernel.
        contrib = (lse - tgt) * w                                 # (CG, 1, 128)
        return acc + jnp.sum(contrib, axis=0)                     # (1, 128)

    acc = lax.fori_loop(0, n_chunks, body,
                        jnp.zeros((1, lanes), jnp.float32), unroll=unroll)
    out_ref[...] = acc.reshape(1, 1, lanes)


def pseudolikelihood(batch, logits, weight, *, logits_tile_bytes=8 * 1024 * 1024):
    """EnergyBasedModel.cross_entropy: sum_b weight[b] * sum_l CE(logits[b,l], batch[b,l]).

    `batch` is (B, L) integer targets or (B, L, d) one-hot (argmax'd, mirroring
    the reference); `logits` is (B, L, d) float (bf16 recommended in HBM);
    `weight` is (B,).
    """
    B, L, d = logits.shape
    if batch.ndim == 3:
        tokens = jnp.argmax(batch, axis=-1)            # matches torch argmax path
    else:
        tokens = batch
    tokens = tokens.reshape(B * L).astype(jnp.int32)

    R = B * L
    d_pad = _round_up(d, _SUBLANES)
    itemsize = jnp.dtype(logits.dtype).itemsize
    neg_fill = float(jnp.finfo(logits.dtype).min)      # vocab pad: large negative, NOT 0

    # ---- tile sizes derived from bytes under a generation-aware VMEM budget ----
    n_groups = _cdiv(R, _LANES)                        # 128-row groups of real data
    # Groups per inner-loop chunk: keep each f32 temporary ~<= 128 KiB.
    cg = max(1, min((128 * 1024) // (d_pad * _LANES * 4), n_groups))
    group_logits_bytes = d_pad * _LANES * itemsize
    group_aux_bytes = 2 * _SUBLANES * _LANES * 4       # tok + w (sublane-padded in VMEM)
    vmem_budget = min((_vmem_capacity_bytes() * 3) // 4, 128 * 1024 * 1024)
    temp_bytes = 8 * cg * d_pad * _LANES * 4 + 4 * 1024 * 1024
    per_chunk_block_bytes = cg * (group_logits_bytes + group_aux_bytes)
    max_chunks_vmem = max(1, (vmem_budget - temp_bytes) // (2 * per_chunk_block_bytes))
    max_chunks_bytes = max(1, logits_tile_bytes // max(1, cg * group_logits_bytes))
    total_chunks = _cdiv(n_groups, cg)
    chunks_per_tile = max(1, min(max_chunks_vmem, max_chunks_bytes, total_chunks))
    if total_chunks >= 2:
        # Keep >= 2 grid steps so the "parallel" axis shards across both v7x TCs.
        chunks_per_tile = min(chunks_per_tile, _cdiv(total_chunks, 2))
    tg = chunks_per_tile * cg
    n_tiles = _cdiv(total_chunks, chunks_per_tile)
    g_pad = n_tiles * tg
    r_pad = g_pad * _LANES
    unroll = True if chunks_per_tile <= 4 else 2

    # ---- lane-dense re-layout: rows -> lanes, vocab -> sublanes ---------------
    # TODO(synk): this transpose is one extra HBM round trip as a separate XLA
    # op; produce the logits in (groups, d, 128) layout upstream to avoid it.
    logits2 = logits.reshape(R, d)
    if d_pad > d:
        logits2 = jnp.pad(logits2, ((0, 0), (0, d_pad - d)), constant_values=neg_fill)
    w_row = jnp.repeat(weight.astype(jnp.float32), L)  # per-token weight
    if r_pad > R:
        logits2 = jnp.pad(logits2, ((0, r_pad - R), (0, 0)))   # padded rows: weight 0
        tokens = jnp.pad(tokens, (0, r_pad - R))
        w_row = jnp.pad(w_row, (0, r_pad - R))
    x_ld = logits2.reshape(g_pad, _LANES, d_pad).transpose(0, 2, 1)   # (G, d_pad, 128)
    tok_ld = tokens.reshape(g_pad, 1, _LANES)                         # (G, 1, 128) int32
    w_ld = w_row.reshape(g_pad, 1, _LANES)                            # (G, 1, 128) f32

    partials = pl.pallas_call(
        functools.partial(_pseudolikelihood_kernel, cg=cg, unroll=unroll),
        out_shape=jax.ShapeDtypeStruct((n_tiles, 1, _LANES), jnp.float32),
        grid=(n_tiles,),
        in_specs=[
            pl.BlockSpec((tg, d_pad, _LANES), lambda i: (i, 0, 0)),
            pl.BlockSpec((tg, 1, _LANES), lambda i: (i, 0, 0)),
            pl.BlockSpec((tg, 1, _LANES), lambda i: (i, 0, 0)),
        ],
        out_specs=pl.BlockSpec((1, 1, _LANES), lambda i: (i, 0, 0)),
        compiler_params=pltpu.CompilerParams(
            dimension_semantics=("parallel",),
            vmem_limit_bytes=int(vmem_budget),
        ),
    )(x_ld, tok_ld, w_ld)
    # Tiny lane-dense partials; single final reduction in plain JAX.
    return jnp.sum(partials)


def _reference(tokens, logits, weight):
    # Pure-JAX reference mirroring torch.nn.functional.cross_entropy semantics.
    logits = logits.astype(jnp.float32)
    lse = jax.nn.logsumexp(logits, axis=-1)                               # (B, L)
    tgt = jnp.take_along_axis(logits, tokens[..., None].astype(jnp.int32),
                              axis=-1)[..., 0]
    ce = jnp.sum(lse - tgt, axis=-1)                                      # (B,)
    return jnp.sum(ce * weight.astype(jnp.float32))


if __name__ == "__main__":
    def run_case(B, L, d, key):
        k_tok, k_logit, k_w = jax.random.split(key, 3)
        tokens = jax.random.randint(k_tok, (B, L), 0, d, dtype=jnp.int32)
        # Store logits in bf16 in HBM; the kernel upcasts to f32 for the math.
        logits = jax.random.normal(k_logit, (B, L, d), jnp.float32).astype(jnp.bfloat16)
        weight = jax.random.uniform(k_w, (B,), dtype=jnp.float32)

        ref = _reference(tokens, logits, weight)

        out = jax.block_until_ready(pseudolikelihood(tokens, logits, weight))
        assert jnp.allclose(out, ref, rtol=1e-5, atol=1e-3), (B, L, d, out, ref)

        # Also exercise the one-hot `batch` path of the reference API.
        onehot = jax.nn.one_hot(tokens, d, dtype=jnp.float32)
        out2 = jax.block_until_ready(pseudolikelihood(onehot, logits, weight))
        assert jnp.allclose(out2, ref, rtol=1e-5, atol=1e-3), (B, L, d, out2, ref)

    key = jax.random.PRNGKey(0)
    k1, k2 = jax.random.split(key)
    # Small shapes consistent with the module: EnergyBasedModel(L, d).
    run_case(2, 8, 32, k1)      # tiny single-tile case
    run_case(8, 200, 21, k2)    # protein-style alphabet, exercises vocab pad + 2 grid tiles

    print("KERNEL_OK")
</pallas_src>

<mosaic_0001>
module attributes {stable_mosaic.version = 11 : i64} {
  func.func @_pseudolikelihood_kernel(%arg0: i32, %arg1: memref<1x32x128xbf16, #tpu.memory_space<vmem>>, %arg2: memref<1x1x128xi32, #tpu.memory_space<vmem>>, %arg3: memref<1x1x128xf32, #tpu.memory_space<vmem>>, %arg4: memref<1x1x128xf32, #tpu.memory_space<vmem>>) attributes {dimension_semantics = [#tpu.dimension_semantics<parallel>], iteration_bounds = array<i64: 1>, scalar_prefetch = 0 : i64, scratch_operands = 0 : i64, tpu.core_type = #tpu.core_type<tc>, window_params = [{transform_indices = @transform_0, window_bounds = array<i64: 1, 32, 128>}, {transform_indices = @transform_1, window_bounds = array<i64: 1, 1, 128>}, {transform_indices = @transform_2, window_bounds = array<i64: 1, 1, 128>}, {transform_indices = @transform_3, window_bounds = array<i64: 1, 1, 128>}]} {
    %0 = tpu.iota {dimensions = array<i32: 1>} : vector<1x32x128xi32>
    %cst = arith.constant 0.000000e+00 : f32
    %1 = vector.broadcast %cst : f32 to vector<1x128xf32>
    %c0_i32 = arith.constant 0 : i32
    %c1_i32 = arith.constant 1 : i32
    %2 = arith.muli %c0_i32, %c1_i32 : i32
    %3 = tpu.assume_multiple %2, 1 : i32
    %4 = arith.index_cast %3 : i32 to index
    %c0 = arith.constant 0 : index
    %c0_0 = arith.constant 0 : index
    %5 = vector.load %arg1[%4, %c0, %c0_0] : memref<1x32x128xbf16, #tpu.memory_space<vmem>>, vector<1x32x128xbf16>
    %6 = arith.extf %5 : vector<1x32x128xbf16> to vector<1x32x128xf32>
    %7 = arith.index_cast %3 : i32 to index
    %c0_1 = arith.constant 0 : index
    %c0_2 = arith.constant 0 : index
    %8 = vector.load %arg2[%7, %c0_1, %c0_2] : memref<1x1x128xi32, #tpu.memory_space<vmem>>, vector<1x1x128xi32>
    %9 = arith.index_cast %3 : i32 to index
    %c0_3 = arith.constant 0 : index
    %c0_4 = arith.constant 0 : index
    %10 = vector.load %arg3[%9, %c0_3, %c0_4] : memref<1x1x128xf32, #tpu.memory_space<vmem>>, vector<1x1x128xf32>
    %cst_5 = arith.constant dense<0xFF800000> : vector<1x128xf32>
    %11 = vector.multi_reduction <maximumf>, %6, %cst_5 [1] : vector<1x32x128xf32> to vector<1x128xf32>
    %12 = vector.shape_cast %11 : vector<1x128xf32> to vector<1x1x128xf32>
    %13 = vector.broadcast %12 : vector<1x1x128xf32> to vector<1x32x128xf32>
    %14 = arith.subf %6, %13 : vector<1x32x128xf32>
    %15 = math.exp %14 : vector<1x32x128xf32>
    %cst_6 = arith.constant dense<0.000000e+00> : vector<1x128xf32>
    %16 = vector.multi_reduction <add>, %15, %cst_6 [1] : vector<1x32x128xf32> to vector<1x128xf32>
    %17 = vector.shape_cast %16 : vector<1x128xf32> to vector<1x1x128xf32>
    %18 = math.log %17 : vector<1x1x128xf32>
    %19 = arith.addf %18, %12 : vector<1x1x128xf32>
    %20 = vector.broadcast %8 : vector<1x1x128xi32> to vector<1x32x128xi32>
    %21 = arith.cmpi eq, %0, %20 : vector<1x32x128xi32>
    %cst_7 = arith.constant 0.000000e+00 : f32
    %22 = vector.broadcast %cst_7 : f32 to vector<1x32x128xf32>
    %23 = arith.select %21, %6, %22 : vector<1x32x128xi1>, vector<1x32x128xf32>
    %cst_8 = arith.constant dense<0.000000e+00> : vector<1x128xf32>
    %24 = vector.multi_reduction <add>, %23, %cst_8 [1] : vector<1x32x128xf32> to vector<1x128xf32>
    %25 = vector.shape_cast %24 : vector<1x128xf32> to vector<1x1x128xf32>
    %26 = arith.subf %19, %25 : vector<1x1x128xf32>
    %27 = arith.mulf %26, %10 : vector<1x1x128xf32>
    %cst_9 = arith.constant dense<0.000000e+00> : vector<1x128xf32>
    %28 = vector.multi_reduction <add>, %27, %cst_9 [0] : vector<1x1x128xf32> to vector<1x128xf32>
    %29 = arith.addf %1, %28 : vector<1x128xf32>
    %c1_i32_10 = arith.constant 1 : i32
    %30 = vector.shape_cast %29 : vector<1x128xf32> to vector<1x1x128xf32>
    %c0_11 = arith.constant 0 : index
    %c0_12 = arith.constant 0 : index
    %c0_13 = arith.constant 0 : index
    %31 = vector.load %arg4[%c0_11, %c0_12, %c0_13] : memref<1x1x128xf32, #tpu.memory_space<vmem>>, vector<1x1x128xf32>
    tpu.vector_store %arg4[%c0_11, %c0_12, %c0_13], %30 {strides = array<i32>} : memref<1x1x128xf32, #tpu.memory_space<vmem>>, vector<1x1x128xf32>,
    return
  }
  func.func @transform_0(%arg0: i32) -> (i32, i32, i32) {
    %c0_i32 = arith.constant 0 : i32
    %c0_i32_0 = arith.constant 0 : i32
    %c0_i32_1 = arith.constant 0 : i32
    return %arg0, %c0_i32, %c0_i32_0 : i32, i32, i32
  }
  func.func @transform_1(%arg0: i32) -> (i32, i32, i32) {
    %c0_i32 = arith.constant 0 : i32
    %c0_i32_0 = arith.constant 0 : i32
    %c0_i32_1 = arith.constant 0 : i32
    return %arg0, %c0_i32, %c0_i32_0 : i32, i32, i32
  }
  func.func @transform_2(%arg0: i32) -> (i32, i32, i32) {
    %c0_i32 = arith.constant 0 : i32
    %c0_i32_0 = arith.constant 0 : i32
    %c0_i32_1 = arith.constant 0 : i32
    return %arg0, %c0_i32, %c0_i32_0 : i32, i32, i32
  }
  func.func @transform_3(%arg0: i32) -> (i32, i32, i32) {
    %c0_i32 = arith.constant 0 : i32
    %c0_i32_0 = arith.constant 0 : i32
    %c0_i32_1 = arith.constant 0 : i32
    return %arg0, %c0_i32, %c0_i32_0 : i32, i32, i32
  }
}

</mosaic_0001>

<bundles_post_ra>
// kernel: tpu_custom_call.1
= control target key start
LH: loop header
LB: loop body
LE: loop exit
PB: predicated region body
PF: predicated region fallthrough
CT: control target
= control target key end

     0   :  { %8 = vsyncpa [#allocation3], 0  ;;  %s247_s0 = inlined_call_operand.hbm [shape: bf16[1,32,128], index: 0, kind: input, shape index: {}]   ;;  %s248_s1 = inlined_call_operand.vmem [shape: s32[1,1,128], index: 1, kind: input, shape index: {}]   ;;  %s249_s2 = inlined_call_operand.vmem [shape: f32[1,1,128], index: 2, kind: input, shape index: {}]   ;;  %s250_s3 = inlined_call_operand.hbm [shape: f32[1,1,128], index: 3, kind: output, shape index: {}]  }
   0x1   :  { %9 = vsyncpa [#allocation4], 0  ;;  %s193_s12 = smov [#allocation2]   ;;  %s145_s16 = scalar_lea.hbm %s247_s0, 256 }
   0x2   :  { %s15_s13 = sshll.u32 %s193_s12, 4  ;;  %p146_p0 = scmp.ne.s32.totalorder %s247_s0, %s145_s16  ;;  %s16_s13 = int_to_ptr.vmem [resolvable:$true] %s15_s13 }
   0x3   :  { %p149_p1 = scmp.lt.u32.totalorder %s145_s16, %s247_s0 }
   0x5   :  { %p151_p2 = pnand %p149_p1, %p146_p0 }
   0x7   :  { %154 = shalt.err (!%p151_p2)
}
   0x8   :  { %s155_s21 = scalar_lea.vmem %s16_s13, 256  ;;  %p160_p4 = scmp.lt.s32.totalorder %s16_s13, %s16_s13 }
   0x9   :  { %p156_p3 = scmp.ne.s32.totalorder %s16_s13, %s155_s21  ;;  %p161_p5 = scmp.lt.s32.totalorder %s155_s21, %s155_s21 }
   0xb   :  { %p162_p6 = por %p161_p5, %p160_p4 }
   0xd   :  { %p163_p7 = pnand %p162_p6, %p156_p3 }
   0xf   :  { %166 = shalt.err (!%p163_p7)
}
  0x10   :  { %s194_s22 = smov 64   ;;  %s195_s23 = smov 4  }
  0x11   :  { %21 = dma.hbm_to_vmem [thread:$0]  %s247_s0, 256, %s16_s13, [#allocation3], %s194_s22, %s194_s22, %s195_s23  }
  0x12   :  { %189 = dma.done.wait [#allocation3], 256  }
  0x13   :  { %190 = vsyncadd [#allocation3], 4294967040  ;;  %v123_v0 = vld [vmem:[#allocation2] sm:$0xff]   ;;  %v130_v1 = vld [vmem:[#allocation2 + $0x8] sm:$0xff]   ;;  %v29_v13 = vlaneseq  ;;  %s196_s28 = smov [#allocation5]  }
  0x14   :  { %v124_v2 = vunpack.c.l.bf16 %v123_v0  ;;  %v125_v3 = vunpack.c.h.bf16 %v123_v0  ;;  %v128_v4 = vunpack.c.l.bf16 %v130_v1  ;;  %v129_v5 = vunpack.c.h.bf16 %v130_v1  ;;  %v121_v26 = vld [vmem:[%s248_s1] ss:$0 sm:$0xff]  ;;  %s112_s29 = sshll.u32 %s196_s28, 4  ;;  %s113_s29 = int_to_ptr.vmem [resolvable:$true] %s112_s29 }
  0x15   :  { %v30_v16 = vshrl.u32 %v29_v13, 7  ;;  %v46_v58 = vld [vmem:[%s249_s2] sm:$0x1]  ;;  %s167_s30 = scalar_lea.vmem %s113_s29, 16  ;;  %s171_s4 = scalar_lea.vmem %s113_s29, 32 }
  0x16   :  { %v47_v6 = vmax.f32 %v124_v2, %v125_v3  ;;  %v48_v7 = vmax.f32 %v128_v4, %v129_v5  ;;  %p168_p8 = scmp.ne.s32.totalorder %s113_s29, %s167_s30  ;;  %p172_p9 = scmp.lt.s32.totalorder %s113_s29, %s113_s29 }
  0x17   :  { %v31_v24 = vadd.s32 8, %v30_v16  ;;  %v32_v27 = vadd.s32 16, %v30_v16  ;;  %vm84_vm0 = vcmp.eq.s32.totalorder %v30_v16, %v121_v26  ;;  %v33_v30 = vadd.s32 24, %v30_v16  ;;  %p173_p10 = scmp.lt.s32.totalorder %s171_s4, %s167_s30 }
  0x18   :  { %v49_v8 = vmax.f32 %v47_v6, %v48_v7  ;;  %v88_v28 = vsel %vm84_vm0, %v124_v2, 0.0 }
  0x19   :  { %vm85_vm1 = vcmp.eq.s32.totalorder %v31_v24, %v121_v26  ;;  %vm86_vm2 = vcmp.eq.s32.totalorder %v32_v27, %v121_v26  ;;  %vm87_vm3 = vcmp.eq.s32.totalorder %v33_v30, %v121_v26  ;;  %p174_p11 = por %p173_p10, %p172_p9 }
  0x1a   :  { %v50_v9 = vrot.slane %v49_v8, 4  ;;  %v89_v29 = vsel %vm85_vm1, %v125_v3, 0.0  ;;  %v90_v33 = vsel %vm86_vm2, %v128_v4, 0.0  ;;  %v91_v40 = vsel %vm87_vm3, %v129_v5, 0.0 }
  0x1b   :  { %v92_v31 = vadd.f32 %v89_v29, %v88_v28  ;;  %p175_p12 = pnand %p174_p11, %p168_p8 }
  0x1c   :  { %v51_v10 = vmax.f32 %v49_v8, %v50_v9 }
  0x1d   :  { %v93_v38 = vadd.f32 %v92_v31, %v90_v33 }
  0x1e   :  { %v52_v11 = vrot.slane %v51_v10, 2 }
  0x1f   :  { %v94_v42 = vadd.f32 %v93_v38, %v91_v40 }
  0x20   :  { %v53_v12 = vmax.f32 %v51_v10, %v52_v11 }
  0x21   :  { %v95_v45 = vrot.slane %v94_v42, 4 }
  0x22   :  { %v54_v14 = vrot.slane %v53_v12, 1 }
  0x23   :  { %v96_v48 = vadd.f32 %v95_v45, %v94_v42 }
  0x24   :  { %v55_v15 = vmax.f32 %v53_v12, %v54_v14 }
  0x25   :  { %v97_v51 = vrot.slane %v96_v48, 2 }
  0x26   :  { %v56_v17 = vsub.f32 %v124_v2, %v55_v15  ;;  %v57_v18 = vsub.f32 %v125_v3, %v55_v15  ;;  %v58_v19 = vsub.f32 %v128_v4, %v55_v15  ;;  %v59_v20 = vsub.f32 %v129_v5, %v55_v15 }
  0x27   :  { %v98_v52 = vadd.f32 %v97_v51, %v96_v48 }
  0x28   :  { %v60_v21 = vmul.f32 1.442695, %v56_v17  ;;  %v62_v22 = vmul.f32 1.442695, %v57_v18  ;;  %v64_v23 = vmul.f32 1.442695, %v58_v19 }
  0x29   :  { %v66_v25 = vmul.f32 1.442695, %v59_v20  ;;  %v99_v53 = vrot.slane %v98_v52, 1 }
  0x2a   :  { %135 = vpow2.f32 %v60_v21 }
  0x2b   :  { %137 = vpow2.f32 %v62_v22  ;;  %v100_v56 = vadd.f32 %v99_v53, %v98_v52 }
  0x2c   :  { %139 = vpow2.f32 %v64_v23 }
  0x2d   :  { %141 = vpow2.f32 %v66_v25 }
  0x34   :  { %v136_v32 = vpop.eup %135 }
  0x35   :  { %v138_v34 = vpop.eup %137 }
  0x36   :  { %v140_v35 = vpop.eup %139  ;;  %v68_v36 = vadd.f32 %v138_v34, %v136_v32 }
  0x37   :  { %v142_v37 = vpop.eup %141 }
  0x38   :  { %v69_v39 = vadd.f32 %v140_v35, %v68_v36 }
  0x3a   :  { %v70_v41 = vadd.f32 %v142_v37, %v69_v39 }
  0x3c   :  { %v71_v43 = vrot.slane %v70_v41, 4 }
  0x3e   :  { %v72_v44 = vadd.f32 %v71_v43, %v70_v41 }
  0x40   :  { %v73_v46 = vrot.slane %v72_v44, 2 }
  0x42   :  { %v74_v47 = vadd.f32 %v73_v46, %v72_v44 }
  0x44   :  { %v75_v49 = vrot.slane %v74_v47, 1 }
  0x46   :  { %v76_v50 = vadd.f32 %v75_v49, %v74_v47 }
  0x48   :  { %143 = vlog2.f32 %v76_v50 }
  0x52   :  { %v144_v54 = vpop.eup %143 }
  0x53   :  { %v78_v55 = vmul.f32 0.6931472, %v144_v54 }
  0x55   :  { %v79_v57 = vadd.f32 %v78_v55, %v55_v15 }
  0x57   :  { %v101_v59 = vsub.f32 %v79_v57, %v100_v56 }
  0x59   :  { %v102_v60 = vmul.f32 %v101_v59, %v46_v58 }
  0x5b   :  { %105 = vst [vmem:[#allocation5] sm:$0x1] %v102_v60 }
  0x5c   :  { %178 = shalt.err (!%p175_p12)
}
  0x5d   :  { %s179_s7 = scalar_lea.hbm %s250_s3, 16 }
  0x5e   :  { %p180_p13 = scmp.ne.s32.totalorder %s250_s3, %s179_s7  ;;  %p183_p0 = scmp.lt.u32.totalorder %s179_s7, %s250_s3 }
  0x60   :  { %p185_p1 = pnand %p183_p0, %p180_p13 }
  0x62   :  { %188 = shalt.err (!%p185_p1)
}
  0x63   :  { %115 = dma.vmem_to_hbm [thread:$0]  %s113_s29, 16, %s250_s3, [#allocation4]  }
  0x64   :  { %191 = dma.done.wait [#allocation4], 16  }
  0x65   :  { %192 = vsyncadd [#allocation4], 4294967280 }
  0x66   :  { %119 = vsyncpa [#allocation3], 1 }
  0x67   :  { %120 = vsyncpa [#allocation4], 1 }

</bundles_post_ra>
